<compile_context>
chip_gen: v6e
topology: v6e:2x2x1
jax: 0.10.0
libtpu: 0.0.40
codegen_flags: <defaults>
</compile_context>

<pallas_src>
import functools

import jax
import jax.numpy as jnp
from jax import lax
from jax.experimental import pallas as pl
from jax.experimental.pallas import tpu as pltpu

IN_CH, OUT_CH, K, STRIDE, PAD, EPS = 4, 8, 3, 1, 1, 1e-5
NPARAM = IN_CH + K * K + 4        # packed per-channel parameter columns


# ----------------------------- fused Pallas kernel -------------------------- #

def _fused_dwsep_kernel(x_ref, p_ref, o_ref, *, H, W):
    """1x1 conv + depthwise KxK conv + BatchNorm(batch stats) + ReLU, fused.

    x_ref: (IN_CH, M)   input, channel-major, M = N*H*W flat on the lane axis
    p_ref: (CT, NPARAM) packed per-channel params for this output-channel tile
                        [w1.T | wdw.T | b1 | bdw | gamma | beta]
    o_ref: (CT, M)      output channel tile
    """
    ct = p_ref.shape[0]
    m = x_ref.shape[1]

    p = p_ref[...]
    w1t  = p[:, 0:IN_CH]                                    # (CT, IN_CH)
    wdwt = p[:, IN_CH:IN_CH + K * K]                        # (CT, K*K)
    b1   = p[:, IN_CH + K * K     : IN_CH + K * K + 1]      # (CT, 1)
    bdw  = p[:, IN_CH + K * K + 1 : IN_CH + K * K + 2]
    gam  = p[:, IN_CH + K * K + 2 : IN_CH + K * K + 3]
    bet  = p[:, IN_CH + K * K + 3 : IN_CH + K * K + 4]

    # ---- 1x1 pointwise conv: IN_CH broadcast-FMAs on the VPU (no MXU) ----
    x = x_ref[...]                                          # (IN_CH, M)
    f = jnp.zeros((ct, m), jnp.float32)
    for i in range(IN_CH):                                  # tiny static unroll
        f = f + w1t[:, i:i + 1] * x[i:i + 1, :]
    f = f + b1

    # ---- depthwise KxK conv with 'same' zero padding ----
    # lane index -> (row, col) inside each image (H, W are powers of two here;
    # images are contiguous H*W blocks along the lane axis).
    col = lax.broadcasted_iota(jnp.int32, (1, m), 1)
    xq = col & (W - 1)                                      # col % W
    yq = (col >> (W.bit_length() - 1)) & (H - 1)            # (col // W) % H
    offs = range(-PAD, K - PAD)                             # -1, 0, +1
    xvalid = {d: jnp.logical_and(xq + d >= 0, xq + d < W) for d in offs}
    yvalid = {d: jnp.logical_and(yq + d >= 0, yq + d < H) for d in offs}

    acc = jnp.zeros((ct, m), jnp.float32)
    for kh in range(K):
        dy = kh - PAD
        for kw in range(K):
            dx = kw - PAD
            s = dy * W + dx                                 # flat-index shift
            # shifted[m'] = f[m' + s]  (circular wrap is killed by the masks)
            src = f if s == 0 else pltpu.roll(f, (-s) % m, axis=1)
            ok = jnp.logical_and(yvalid[dy], xvalid[dx])    # (1, M)
            src = jnp.where(ok, src, 0.0)
            acc = acc + wdwt[:, kh * K + kw : kh * K + kw + 1] * src
    acc = acc + bdw

    # ---- BatchNorm (training batch stats over N*H*W, per channel) + ReLU ----
    inv_m = jnp.float32(1.0 / m)
    mean = jnp.sum(acc, axis=1, keepdims=True) * inv_m      # (CT, 1)
    ex2 = jnp.sum(acc * acc, axis=1, keepdims=True) * inv_m  # one-pass stats
    var = ex2 - mean * mean
    scale = gam * lax.rsqrt(var + EPS)                      # EUP
    shift = bet - mean * scale
    o_ref[...] = jnp.maximum(acc * scale + shift, 0.0)      # dense 512-lane store


# ---------------------------------- wrapper --------------------------------- #

def depth_separable_conv_layer(x_nchw, params):
    """params = (w1 (Cin,Cout), b1 (Cout,), wdw (K*K,Cout), bdw (Cout,),
                 gamma (Cout,), beta (Cout,))"""
    w1, b1, wdw, bdw, gamma, beta = params
    n, cin, _, _ = x_nchw.shape
    assert cin == IN_CH

    # stride of the 1x1 conv (kernel_size=1, padding=0 -> pure subsample)
    xs = x_nchw[:, :, ::STRIDE, ::STRIDE]
    ho, wo = xs.shape[2], xs.shape[3]
    m = n * ho * wo
    # TODO(synk): in-kernel coord masks assume power-of-two H/W; pass
    # precomputed (row, col) lane maps for general sizes.
    assert ho & (ho - 1) == 0 and wo & (wo - 1) == 0

    # channel-major, lane-dense layout (pure XLA-side layout plumbing)
    x_cm = jnp.transpose(xs, (1, 0, 2, 3)).reshape(IN_CH, m).astype(jnp.float32)

    # pack all per-output-channel params into one (OUT_CH, NPARAM) matrix
    p = jnp.concatenate(
        [w1.T, wdw.T, b1[:, None], bdw[:, None], gamma[:, None], beta[:, None]],
        axis=1).astype(jnp.float32)

    ct = OUT_CH            # channel tile; larger layers => more grid steps
    kernel = functools.partial(_fused_dwsep_kernel, H=ho, W=wo)
    out_cm = pl.pallas_call(
        kernel,
        out_shape=jax.ShapeDtypeStruct((OUT_CH, m), jnp.float32),
        grid=(OUT_CH // ct,),
        in_specs=[
            pl.BlockSpec((IN_CH, m), lambda c: (0, 0)),      # shared input
            pl.BlockSpec((ct, NPARAM), lambda c: (c, 0)),    # per-tile params
        ],
        out_specs=pl.BlockSpec((ct, m), lambda c: (c, 0)),
        compiler_params=pltpu.CompilerParams(
            dimension_semantics=("parallel",)),              # megacore on v7x
    )(x_cm, p)

    # (Cout, N*H*W) -> NCHW
    return jnp.transpose(out_cm.reshape(OUT_CH, n, ho, wo), (1, 0, 2, 3))


# ------------------------------ pure-JAX reference --------------------------- #

def _reference(x_nchw, params):
    w1, b1, wdw, bdw, gamma, beta = params
    x = jnp.transpose(x_nchw, (0, 2, 3, 1))
    x = x[:, ::STRIDE, ::STRIDE, :]
    f = jnp.einsum('nhwc,cf->nhwf', x, w1) + b1
    rhs = wdw.reshape(K, K, OUT_CH)[:, :, None, :]           # HWIO, I=1 (grouped)
    f = lax.conv_general_dilated(
        f, rhs, (1, 1), [(PAD, PAD), (PAD, PAD)],
        dimension_numbers=('NHWC', 'HWIO', 'NHWC'),
        feature_group_count=OUT_CH) + bdw
    mean = jnp.mean(f, axis=(0, 1, 2), keepdims=True)
    var = jnp.mean(jnp.square(f - mean), axis=(0, 1, 2), keepdims=True)
    y = (f - mean) * lax.rsqrt(var + EPS) * gamma + beta
    y = jnp.maximum(y, 0.0)
    return jnp.transpose(y, (0, 3, 1, 2))


# ------------------------------------ main ----------------------------------- #

if __name__ == "__main__":
    key = jax.random.PRNGKey(0)
    kx, k1, k2, k3, k4, k5, k6 = jax.random.split(key, 7)

    x = jax.random.normal(kx, (2, IN_CH, 16, 16), jnp.float32)       # NCHW input

    # deterministic synthetic parameters (shapes match nn.Conv2d / BatchNorm2d)
    w1 = 0.2 * jax.random.normal(k1, (IN_CH, OUT_CH), jnp.float32)     # conv1x1 weight
    b1 = 0.1 * jax.random.normal(k2, (OUT_CH,), jnp.float32)           # conv1x1 bias
    wdw = 0.2 * jax.random.normal(k3, (K * K, OUT_CH), jnp.float32)    # depthwise weight
    bdw = 0.1 * jax.random.normal(k4, (OUT_CH,), jnp.float32)          # depthwise bias
    gamma = 1.0 + 0.1 * jax.random.normal(k5, (OUT_CH,), jnp.float32)  # BN weight
    beta = 0.1 * jax.random.normal(k6, (OUT_CH,), jnp.float32)         # BN bias
    params = (w1, b1, wdw, bdw, gamma, beta)

    out = jax.block_until_ready(jax.jit(depth_separable_conv_layer)(x, params))
    ref = jax.block_until_ready(_reference(x, params))

    assert out.shape == (2, OUT_CH, 16, 16), out.shape
    assert jnp.allclose(out, ref, atol=1e-3, rtol=1e-3), \
        float(jnp.max(jnp.abs(out - ref)))

    print("KERNEL_OK")
</pallas_src>

<mosaic_0001>
module attributes {stable_mosaic.version = 11 : i64} {
  func.func @_fused_dwsep_kernel(%arg0: i32, %arg1: memref<4x512xf32, #tpu.memory_space<vmem>>, %arg2: memref<8x17xf32, #tpu.memory_space<vmem>>, %arg3: memref<8x512xf32, #tpu.memory_space<vmem>>) attributes {dimension_semantics = [#tpu.dimension_semantics<parallel>], iteration_bounds = array<i64: 1>, scalar_prefetch = 0 : i64, scratch_operands = 0 : i64, tpu.core_type = #tpu.core_type<tc>, window_params = [{pipeline_mode = #tpu.pipeline_mode<synchronous>, transform_indices = @transform_0, window_bounds = array<i64: 4, 512>}, {transform_indices = @transform_1, window_bounds = array<i64: 8, 17>}, {transform_indices = @transform_2, window_bounds = array<i64: 8, 512>}]} {
    %c0 = arith.constant 0 : index
    %c0_0 = arith.constant 0 : index
    %0 = vector.load %arg2[%c0, %c0_0] : memref<8x17xf32, #tpu.memory_space<vmem>>, vector<8x17xf32>
    %1 = vector.extract_strided_slice %0 {offsets = [0, 0], sizes = [8, 4], strides = [1, 1]} : vector<8x17xf32> to vector<8x4xf32>
    %2 = vector.extract_strided_slice %0 {offsets = [0, 4], sizes = [8, 9], strides = [1, 1]} : vector<8x17xf32> to vector<8x9xf32>
    %3 = vector.extract_strided_slice %0 {offsets = [0, 13], sizes = [8, 1], strides = [1, 1]} : vector<8x17xf32> to vector<8x1xf32>
    %4 = vector.extract_strided_slice %0 {offsets = [0, 14], sizes = [8, 1], strides = [1, 1]} : vector<8x17xf32> to vector<8x1xf32>
    %5 = vector.extract_strided_slice %0 {offsets = [0, 15], sizes = [8, 1], strides = [1, 1]} : vector<8x17xf32> to vector<8x1xf32>
    %6 = vector.extract_strided_slice %0 {offsets = [0, 16], sizes = [8, 1], strides = [1, 1]} : vector<8x17xf32> to vector<8x1xf32>
    %c0_1 = arith.constant 0 : index
    %c0_2 = arith.constant 0 : index
    %7 = vector.load %arg1[%c0_1, %c0_2] : memref<4x512xf32, #tpu.memory_space<vmem>>, vector<4x512xf32>
    %cst = arith.constant 0.000000e+00 : f32
    %8 = vector.broadcast %cst : f32 to vector<8x512xf32>
    %9 = vector.extract_strided_slice %1 {offsets = [0, 0], sizes = [8, 1], strides = [1, 1]} : vector<8x4xf32> to vector<8x1xf32>
    %10 = vector.extract_strided_slice %7 {offsets = [0, 0], sizes = [1, 512], strides = [1, 1]} : vector<4x512xf32> to vector<1x512xf32>
    %11 = vector.broadcast %9 : vector<8x1xf32> to vector<8x512xf32>
    %12 = vector.broadcast %10 : vector<1x512xf32> to vector<8x512xf32>
    %13 = arith.mulf %11, %12 : vector<8x512xf32>
    %14 = arith.addf %8, %13 : vector<8x512xf32>
    %15 = vector.extract_strided_slice %1 {offsets = [0, 1], sizes = [8, 1], strides = [1, 1]} : vector<8x4xf32> to vector<8x1xf32>
    %16 = vector.extract_strided_slice %7 {offsets = [1, 0], sizes = [1, 512], strides = [1, 1]} : vector<4x512xf32> to vector<1x512xf32>
    %17 = vector.broadcast %15 : vector<8x1xf32> to vector<8x512xf32>
    %18 = vector.broadcast %16 : vector<1x512xf32> to vector<8x512xf32>
    %19 = arith.mulf %17, %18 : vector<8x512xf32>
    %20 = arith.addf %14, %19 : vector<8x512xf32>
    %21 = vector.extract_strided_slice %1 {offsets = [0, 2], sizes = [8, 1], strides = [1, 1]} : vector<8x4xf32> to vector<8x1xf32>
    %22 = vector.extract_strided_slice %7 {offsets = [2, 0], sizes = [1, 512], strides = [1, 1]} : vector<4x512xf32> to vector<1x512xf32>
    %23 = vector.broadcast %21 : vector<8x1xf32> to vector<8x512xf32>
    %24 = vector.broadcast %22 : vector<1x512xf32> to vector<8x512xf32>
    %25 = arith.mulf %23, %24 : vector<8x512xf32>
    %26 = arith.addf %20, %25 : vector<8x512xf32>
    %27 = vector.extract_strided_slice %1 {offsets = [0, 3], sizes = [8, 1], strides = [1, 1]} : vector<8x4xf32> to vector<8x1xf32>
    %28 = vector.extract_strided_slice %7 {offsets = [3, 0], sizes = [1, 512], strides = [1, 1]} : vector<4x512xf32> to vector<1x512xf32>
    %29 = vector.broadcast %27 : vector<8x1xf32> to vector<8x512xf32>
    %30 = vector.broadcast %28 : vector<1x512xf32> to vector<8x512xf32>
    %31 = arith.mulf %29, %30 : vector<8x512xf32>
    %32 = arith.addf %26, %31 : vector<8x512xf32>
    %33 = vector.broadcast %3 : vector<8x1xf32> to vector<8x512xf32>
    %34 = arith.addf %32, %33 : vector<8x512xf32>
    %35 = tpu.iota {dimensions = array<i32: 1>} : vector<1x512xi32>
    %c15_i32 = arith.constant 15 : i32
    %36 = vector.broadcast %c15_i32 : i32 to vector<1x512xi32>
    %37 = arith.andi %35, %36 : vector<1x512xi32>
    %c4_i32 = arith.constant 4 : i32
    %38 = vector.broadcast %c4_i32 : i32 to vector<1x512xi32>
    %39 = arith.shrsi %35, %38 : vector<1x512xi32>
    %c15_i32_3 = arith.constant 15 : i32
    %40 = vector.broadcast %c15_i32_3 : i32 to vector<1x512xi32>
    %41 = arith.andi %39, %40 : vector<1x512xi32>
    %c-1_i32 = arith.constant -1 : i32
    %42 = vector.broadcast %c-1_i32 : i32 to vector<1x512xi32>
    %43 = arith.addi %37, %42 : vector<1x512xi32>
    %c0_i32 = arith.constant 0 : i32
    %44 = vector.broadcast %c0_i32 : i32 to vector<1x512xi32>
    %45 = arith.cmpi sge, %43, %44 : vector<1x512xi32>
    %c-1_i32_4 = arith.constant -1 : i32
    %46 = vector.broadcast %c-1_i32_4 : i32 to vector<1x512xi32>
    %47 = arith.addi %37, %46 : vector<1x512xi32>
    %c16_i32 = arith.constant 16 : i32
    %48 = vector.broadcast %c16_i32 : i32 to vector<1x512xi32>
    %49 = arith.cmpi slt, %47, %48 : vector<1x512xi32>
    %50 = arith.andi %45, %49 : vector<1x512xi1>
    %c0_i32_5 = arith.constant 0 : i32
    %51 = vector.broadcast %c0_i32_5 : i32 to vector<1x512xi32>
    %52 = arith.addi %37, %51 : vector<1x512xi32>
    %c0_i32_6 = arith.constant 0 : i32
    %53 = vector.broadcast %c0_i32_6 : i32 to vector<1x512xi32>
    %54 = arith.cmpi sge, %52, %53 : vector<1x512xi32>
    %c0_i32_7 = arith.constant 0 : i32
    %55 = vector.broadcast %c0_i32_7 : i32 to vector<1x512xi32>
    %56 = arith.addi %37, %55 : vector<1x512xi32>
    %c16_i32_8 = arith.constant 16 : i32
    %57 = vector.broadcast %c16_i32_8 : i32 to vector<1x512xi32>
    %58 = arith.cmpi slt, %56, %57 : vector<1x512xi32>
    %59 = arith.andi %54, %58 : vector<1x512xi1>
    %c1_i32 = arith.constant 1 : i32
    %60 = vector.broadcast %c1_i32 : i32 to vector<1x512xi32>
    %61 = arith.addi %37, %60 : vector<1x512xi32>
    %c0_i32_9 = arith.constant 0 : i32
    %62 = vector.broadcast %c0_i32_9 : i32 to vector<1x512xi32>
    %63 = arith.cmpi sge, %61, %62 : vector<1x512xi32>
    %c1_i32_10 = arith.constant 1 : i32
    %64 = vector.broadcast %c1_i32_10 : i32 to vector<1x512xi32>
    %65 = arith.addi %37, %64 : vector<1x512xi32>
    %c16_i32_11 = arith.constant 16 : i32
    %66 = vector.broadcast %c16_i32_11 : i32 to vector<1x512xi32>
    %67 = arith.cmpi slt, %65, %66 : vector<1x512xi32>
    %68 = arith.andi %63, %67 : vector<1x512xi1>
    %c-1_i32_12 = arith.constant -1 : i32
    %69 = vector.broadcast %c-1_i32_12 : i32 to vector<1x512xi32>
    %70 = arith.addi %41, %69 : vector<1x512xi32>
    %c0_i32_13 = arith.constant 0 : i32
    %71 = vector.broadcast %c0_i32_13 : i32 to vector<1x512xi32>
    %72 = arith.cmpi sge, %70, %71 : vector<1x512xi32>
    %c-1_i32_14 = arith.constant -1 : i32
    %73 = vector.broadcast %c-1_i32_14 : i32 to vector<1x512xi32>
    %74 = arith.addi %41, %73 : vector<1x512xi32>
    %c16_i32_15 = arith.constant 16 : i32
    %75 = vector.broadcast %c16_i32_15 : i32 to vector<1x512xi32>
    %76 = arith.cmpi slt, %74, %75 : vector<1x512xi32>
    %77 = arith.andi %72, %76 : vector<1x512xi1>
    %c0_i32_16 = arith.constant 0 : i32
    %78 = vector.broadcast %c0_i32_16 : i32 to vector<1x512xi32>
    %79 = arith.addi %41, %78 : vector<1x512xi32>
    %c0_i32_17 = arith.constant 0 : i32
    %80 = vector.broadcast %c0_i32_17 : i32 to vector<1x512xi32>
    %81 = arith.cmpi sge, %79, %80 : vector<1x512xi32>
    %c0_i32_18 = arith.constant 0 : i32
    %82 = vector.broadcast %c0_i32_18 : i32 to vector<1x512xi32>
    %83 = arith.addi %41, %82 : vector<1x512xi32>
    %c16_i32_19 = arith.constant 16 : i32
    %84 = vector.broadcast %c16_i32_19 : i32 to vector<1x512xi32>
    %85 = arith.cmpi slt, %83, %84 : vector<1x512xi32>
    %86 = arith.andi %81, %85 : vector<1x512xi1>
    %c1_i32_20 = arith.constant 1 : i32
    %87 = vector.broadcast %c1_i32_20 : i32 to vector<1x512xi32>
    %88 = arith.addi %41, %87 : vector<1x512xi32>
    %c0_i32_21 = arith.constant 0 : i32
    %89 = vector.broadcast %c0_i32_21 : i32 to vector<1x512xi32>
    %90 = arith.cmpi sge, %88, %89 : vector<1x512xi32>
    %c1_i32_22 = arith.constant 1 : i32
    %91 = vector.broadcast %c1_i32_22 : i32 to vector<1x512xi32>
    %92 = arith.addi %41, %91 : vector<1x512xi32>
    %c16_i32_23 = arith.constant 16 : i32
    %93 = vector.broadcast %c16_i32_23 : i32 to vector<1x512xi32>
    %94 = arith.cmpi slt, %92, %93 : vector<1x512xi32>
    %95 = arith.andi %90, %94 : vector<1x512xi1>
    %cst_24 = arith.constant 0.000000e+00 : f32
    %96 = vector.broadcast %cst_24 : f32 to vector<8x512xf32>
    %c17_i32 = arith.constant 17 : i32
    %97 = tpu.dynamic_rotate %34 by %c17_i32 dim 1 : vector<8x512xf32>, i32 -> vector<8x512xf32>
    %98 = arith.andi %77, %50 : vector<1x512xi1>
    %cst_25 = arith.constant 0.000000e+00 : f32
    %99 = vector.shape_cast %98 : vector<1x512xi1> to vector<1x512xi1>
    %100 = vector.broadcast %99 : vector<1x512xi1> to vector<8x512xi1>
    %101 = vector.broadcast %cst_25 : f32 to vector<8x512xf32>
    %102 = arith.select %100, %97, %101 : vector<8x512xi1>, vector<8x512xf32>
    %103 = vector.extract_strided_slice %2 {offsets = [0, 0], sizes = [8, 1], strides = [1, 1]} : vector<8x9xf32> to vector<8x1xf32>
    %104 = vector.broadcast %103 : vector<8x1xf32> to vector<8x512xf32>
    %105 = arith.mulf %104, %102 : vector<8x512xf32>
    %106 = arith.addf %96, %105 : vector<8x512xf32>
    %c16_i32_26 = arith.constant 16 : i32
    %107 = tpu.dynamic_rotate %34 by %c16_i32_26 dim 1 : vector<8x512xf32>, i32 -> vector<8x512xf32>
    %108 = arith.andi %77, %59 : vector<1x512xi1>
    %cst_27 = arith.constant 0.000000e+00 : f32
    %109 = vector.shape_cast %108 : vector<1x512xi1> to vector<1x512xi1>
    %110 = vector.broadcast %109 : vector<1x512xi1> to vector<8x512xi1>
    %111 = vector.broadcast %cst_27 : f32 to vector<8x512xf32>
    %112 = arith.select %110, %107, %111 : vector<8x512xi1>, vector<8x512xf32>
    %113 = vector.extract_strided_slice %2 {offsets = [0, 1], sizes = [8, 1], strides = [1, 1]} : vector<8x9xf32> to vector<8x1xf32>
    %114 = vector.broadcast %113 : vector<8x1xf32> to vector<8x512xf32>
    %115 = arith.mulf %114, %112 : vector<8x512xf32>
    %116 = arith.addf %106, %115 : vector<8x512xf32>
    %c15_i32_28 = arith.constant 15 : i32
    %117 = tpu.dynamic_rotate %34 by %c15_i32_28 dim 1 : vector<8x512xf32>, i32 -> vector<8x512xf32>
    %118 = arith.andi %77, %68 : vector<1x512xi1>
    %cst_29 = arith.constant 0.000000e+00 : f32
    %119 = vector.shape_cast %118 : vector<1x512xi1> to vector<1x512xi1>
    %120 = vector.broadcast %119 : vector<1x512xi1> to vector<8x512xi1>
    %121 = vector.broadcast %cst_29 : f32 to vector<8x512xf32>
    %122 = arith.select %120, %117, %121 : vector<8x512xi1>, vector<8x512xf32>
    %123 = vector.extract_strided_slice %2 {offsets = [0, 2], sizes = [8, 1], strides = [1, 1]} : vector<8x9xf32> to vector<8x1xf32>
    %124 = vector.broadcast %123 : vector<8x1xf32> to vector<8x512xf32>
    %125 = arith.mulf %124, %122 : vector<8x512xf32>
    %126 = arith.addf %116, %125 : vector<8x512xf32>
    %c1_i32_30 = arith.constant 1 : i32
    %127 = tpu.dynamic_rotate %34 by %c1_i32_30 dim 1 : vector<8x512xf32>, i32 -> vector<8x512xf32>
    %128 = arith.andi %86, %50 : vector<1x512xi1>
    %cst_31 = arith.constant 0.000000e+00 : f32
    %129 = vector.shape_cast %128 : vector<1x512xi1> to vector<1x512xi1>
    %130 = vector.broadcast %129 : vector<1x512xi1> to vector<8x512xi1>
    %131 = vector.broadcast %cst_31 : f32 to vector<8x512xf32>
    %132 = arith.select %130, %127, %131 : vector<8x512xi1>, vector<8x512xf32>
    %133 = vector.extract_strided_slice %2 {offsets = [0, 3], sizes = [8, 1], strides = [1, 1]} : vector<8x9xf32> to vector<8x1xf32>
    %134 = vector.broadcast %133 : vector<8x1xf32> to vector<8x512xf32>
    %135 = arith.mulf %134, %132 : vector<8x512xf32>
    %136 = arith.addf %126, %135 : vector<8x512xf32>
    %137 = arith.andi %86, %59 : vector<1x512xi1>
    %cst_32 = arith.constant 0.000000e+00 : f32
    %138 = vector.shape_cast %137 : vector<1x512xi1> to vector<1x512xi1>
    %139 = vector.broadcast %138 : vector<1x512xi1> to vector<8x512xi1>
    %140 = vector.broadcast %cst_32 : f32 to vector<8x512xf32>
    %141 = arith.select %139, %34, %140 : vector<8x512xi1>, vector<8x512xf32>
    %142 = vector.extract_strided_slice %2 {offsets = [0, 4], sizes = [8, 1], strides = [1, 1]} : vector<8x9xf32> to vector<8x1xf32>
    %143 = vector.broadcast %142 : vector<8x1xf32> to vector<8x512xf32>
    %144 = arith.mulf %143, %141 : vector<8x512xf32>
    %145 = arith.addf %136, %144 : vector<8x512xf32>
    %c511_i32 = arith.constant 511 : i32
    %146 = tpu.dynamic_rotate %34 by %c511_i32 dim 1 : vector<8x512xf32>, i32 -> vector<8x512xf32>
    %147 = arith.andi %86, %68 : vector<1x512xi1>
    %cst_33 = arith.constant 0.000000e+00 : f32
    %148 = vector.shape_cast %147 : vector<1x512xi1> to vector<1x512xi1>
    %149 = vector.broadcast %148 : vector<1x512xi1> to vector<8x512xi1>
    %150 = vector.broadcast %cst_33 : f32 to vector<8x512xf32>
    %151 = arith.select %149, %146, %150 : vector<8x512xi1>, vector<8x512xf32>
    %152 = vector.extract_strided_slice %2 {offsets = [0, 5], sizes = [8, 1], strides = [1, 1]} : vector<8x9xf32> to vector<8x1xf32>
    %153 = vector.broadcast %152 : vector<8x1xf32> to vector<8x512xf32>
    %154 = arith.mulf %153, %151 : vector<8x512xf32>
    %155 = arith.addf %145, %154 : vector<8x512xf32>
    %c497_i32 = arith.constant 497 : i32
    %156 = tpu.dynamic_rotate %34 by %c497_i32 dim 1 : vector<8x512xf32>, i32 -> vector<8x512xf32>
    %157 = arith.andi %95, %50 : vector<1x512xi1>
    %cst_34 = arith.constant 0.000000e+00 : f32
    %158 = vector.shape_cast %157 : vector<1x512xi1> to vector<1x512xi1>
    %159 = vector.broadcast %158 : vector<1x512xi1> to vector<8x512xi1>
    %160 = vector.broadcast %cst_34 : f32 to vector<8x512xf32>
    %161 = arith.select %159, %156, %160 : vector<8x512xi1>, vector<8x512xf32>
    %162 = vector.extract_strided_slice %2 {offsets = [0, 6], sizes = [8, 1], strides = [1, 1]} : vector<8x9xf32> to vector<8x1xf32>
    %163 = vector.broadcast %162 : vector<8x1xf32> to vector<8x512xf32>
    %164 = arith.mulf %163, %161 : vector<8x512xf32>
    %165 = arith.addf %155, %164 : vector<8x512xf32>
    %c496_i32 = arith.constant 496 : i32
    %166 = tpu.dynamic_rotate %34 by %c496_i32 dim 1 : vector<8x512xf32>, i32 -> vector<8x512xf32>
    %167 = arith.andi %95, %59 : vector<1x512xi1>
    %cst_35 = arith.constant 0.000000e+00 : f32
    %168 = vector.shape_cast %167 : vector<1x512xi1> to vector<1x512xi1>
    %169 = vector.broadcast %168 : vector<1x512xi1> to vector<8x512xi1>
    %170 = vector.broadcast %cst_35 : f32 to vector<8x512xf32>
    %171 = arith.select %169, %166, %170 : vector<8x512xi1>, vector<8x512xf32>
    %172 = vector.extract_strided_slice %2 {offsets = [0, 7], sizes = [8, 1], strides = [1, 1]} : vector<8x9xf32> to vector<8x1xf32>
    %173 = vector.broadcast %172 : vector<8x1xf32> to vector<8x512xf32>
    %174 = arith.mulf %173, %171 : vector<8x512xf32>
    %175 = arith.addf %165, %174 : vector<8x512xf32>
    %c495_i32 = arith.constant 495 : i32
    %176 = tpu.dynamic_rotate %34 by %c495_i32 dim 1 : vector<8x512xf32>, i32 -> vector<8x512xf32>
    %177 = arith.andi %95, %68 : vector<1x512xi1>
    %cst_36 = arith.constant 0.000000e+00 : f32
    %178 = vector.shape_cast %177 : vector<1x512xi1> to vector<1x512xi1>
    %179 = vector.broadcast %178 : vector<1x512xi1> to vector<8x512xi1>
    %180 = vector.broadcast %cst_36 : f32 to vector<8x512xf32>
    %181 = arith.select %179, %176, %180 : vector<8x512xi1>, vector<8x512xf32>
    %182 = vector.extract_strided_slice %2 {offsets = [0, 8], sizes = [8, 1], strides = [1, 1]} : vector<8x9xf32> to vector<8x1xf32>
    %183 = vector.broadcast %182 : vector<8x1xf32> to vector<8x512xf32>
    %184 = arith.mulf %183, %181 : vector<8x512xf32>
    %185 = arith.addf %175, %184 : vector<8x512xf32>
    %186 = vector.broadcast %4 : vector<8x1xf32> to vector<8x512xf32>
    %187 = arith.addf %185, %186 : vector<8x512xf32>
    %cst_37 = arith.constant dense<0.000000e+00> : vector<8xf32>
    %188 = vector.multi_reduction <add>, %187, %cst_37 [1] : vector<8x512xf32> to vector<8xf32>
    %189 = vector.shape_cast %188 : vector<8xf32> to vector<8x1xf32>
    %cst_38 = arith.constant 0.001953125 : f32
    %190 = vector.broadcast %cst_38 : f32 to vector<8x1xf32>
    %191 = arith.mulf %189, %190 : vector<8x1xf32>
    %192 = arith.mulf %187, %187 : vector<8x512xf32>
    %cst_39 = arith.constant dense<0.000000e+00> : vector<8xf32>
    %193 = vector.multi_reduction <add>, %192, %cst_39 [1] : vector<8x512xf32> to vector<8xf32>
    %194 = vector.shape_cast %193 : vector<8xf32> to vector<8x1xf32>
    %cst_40 = arith.constant 0.001953125 : f32
    %195 = vector.broadcast %cst_40 : f32 to vector<8x1xf32>
    %196 = arith.mulf %194, %195 : vector<8x1xf32>
    %197 = arith.mulf %191, %191 : vector<8x1xf32>
    %198 = arith.subf %196, %197 : vector<8x1xf32>
    %cst_41 = arith.constant 9.99999974E-6 : f32
    %199 = vector.broadcast %cst_41 : f32 to vector<8x1xf32>
    %200 = arith.addf %198, %199 : vector<8x1xf32>
    %201 = math.rsqrt %200 : vector<8x1xf32>
    %202 = arith.mulf %5, %201 : vector<8x1xf32>
    %203 = arith.mulf %191, %202 : vector<8x1xf32>
    %204 = arith.subf %6, %203 : vector<8x1xf32>
    %205 = vector.broadcast %202 : vector<8x1xf32> to vector<8x512xf32>
    %206 = arith.mulf %187, %205 : vector<8x512xf32>
    %207 = vector.broadcast %204 : vector<8x1xf32> to vector<8x512xf32>
    %208 = arith.addf %206, %207 : vector<8x512xf32>
    %cst_42 = arith.constant 0.000000e+00 : f32
    %209 = vector.broadcast %cst_42 : f32 to vector<8x512xf32>
    %210 = arith.maximumf %208, %209 : vector<8x512xf32>
    %c0_43 = arith.constant 0 : index
    %c0_44 = arith.constant 0 : index
    %211 = vector.load %arg3[%c0_43, %c0_44] : memref<8x512xf32, #tpu.memory_space<vmem>>, vector<8x512xf32>
    tpu.vector_store %arg3[%c0_43, %c0_44], %210 {strides = array<i32>} : memref<8x512xf32, #tpu.memory_space<vmem>>, vector<8x512xf32>,
    return
  }
  func.func @transform_0(%arg0: i32) -> (i32, i32) {
    %c0_i32 = arith.constant 0 : i32
    %c0_i32_0 = arith.constant 0 : i32
    %c0_i32_1 = arith.constant 0 : i32
    return %c0_i32, %c0_i32_0 : i32, i32
  }
  func.func @transform_1(%arg0: i32) -> (i32, i32) {
    %c0_i32 = arith.constant 0 : i32
    %c0_i32_0 = arith.constant 0 : i32
    return %arg0, %c0_i32 : i32, i32
  }
  func.func @transform_2(%arg0: i32) -> (i32, i32) {
    %c0_i32 = arith.constant 0 : i32
    %c0_i32_0 = arith.constant 0 : i32
    return %arg0, %c0_i32 : i32, i32
  }
}

</mosaic_0001>

<bundles_post_ra>
// kernel: depth_separable_conv_layer.1
= control target key start
LH: loop header
LB: loop body
LE: loop exit
PB: predicated region body
PF: predicated region fallthrough
CT: control target
= control target key end

     0   :  { %v788_v0 = vmov 2   ;;  %v789_v1 = vmov 0   ;;  %v790_v3 = vmov 3   ;;  %v791_v4 = vmov 1   ;;  %s804_s14 = smov 16   ;;  %s805_s15 = smov 15   ;;  %s1384_s1 = inlined_call_operand.vmem [shape: f32[8,17], index: 1, kind: input, shape index: {}]   ;;  %s1385_s0 = inlined_call_operand.vmem [shape: f32[4,512], index: 0, kind: input, shape index: {}]   ;;  %s1386_s2 = inlined_call_operand.vmem [shape: f32[8,512], index: 2, kind: output, shape index: {}]  }
   0x1   :  { %770 = vset.pattern.permute.xlu1 %v788_v0  ;;  %768 = vset.pattern.permute.xlu0 %v789_v1  ;;  %v831_v2 = vld [vmem:[%s1384_s1] sm:$0xff]  ;;  %v792_v5 = vmov 13   ;;  %v793_v6 = vmov 4   ;;  %v794_v7 = vmov 5   ;;  %v795_v8 = vmov 7   ;;  %v13_v22 = vld [vmem:[%s1385_s0 + $0x8] sm:$0xff] }
   0x2   :  { %114 = vperm.xlu1 %770, %v831_v2   ;;  %16 = vperm.xlu0 %768, %v831_v2   ;;  %v796_v9 = vmov 6   ;;  %v797_v10 = vmov 9   ;;  %v798_v11 = vmov 8   ;;  %v799_v12 = vmov 12   ;;  %v12_v21 = vld [vmem:[%s1385_s0] sm:$0xff]  ;;  %s803_s0 = smov 17  }
   0x3   :  { %v800_v13 = vmov 10   ;;  %v801_v14 = vmov 11   ;;  %v802_v15 = vmov 14   ;;  %v21_v16 = vlaneseq  ;;  %s806_s16 = smov 1   ;;  %s807_s17 = smov 127  }
   0x4   :  { %s808_s18 = smov 113   ;;  %s809_s19 = smov 112  }
   0x5   :  { %v22_v17 = vshrl.u32 %v21_v16, 7  ;;  %v847_v20 = vand.u32 127, %v21_v16  ;;  %s810_s20 = smov 111  }
   0x6   :  { %771 = vset.pattern.permute.xlu1 %v790_v3  ;;  %769 = vset.pattern.permute.xlu0 %v791_v4 }
   0x7   :  { %162 = vperm.xlu1 %771, %v831_v2   ;;  %66 = vperm.xlu0 %769, %v831_v2   ;;  %v23_v18 = vsub.s32 0, %v22_v17  ;;  %v27_v19 = vsub.s32 4, %v22_v17  ;;  %v855_v23 = vsub.s32 2, %v22_v17  ;;  %v123_v24 = vsub.s32 6, %v22_v17 }
   0x8   :  { %v858_v28 = vadd.s32 128, %v847_v20  ;;  %v71_v29 = vsub.s32 1, %v22_v17  ;;  %v75_v30 = vsub.s32 5, %v22_v17  ;;  %v860_v31 = vsub.s32 3, %v22_v17 }
   0x9   :  { %v24_v25 = vrot.slane %v12_v21, %v23_v18  ;;  %v28_v26 = vrot.slane %v12_v21, %v27_v19  ;;  %v32_v27 = vrot.slane %v13_v22, %v23_v18  ;;  %v36_v32 = vrot.slane %v13_v22, %v27_v19 }
   0xa   :  { %v120_v33 = vrot.slane %v12_v21, %v855_v23  ;;  %v124_v34 = vrot.slane %v12_v21, %v123_v24  ;;  %v171_v35 = vsub.s32 7, %v22_v17  ;;  %v128_v36 = vrot.slane %v13_v22, %v855_v23 }
   0xb   :  { %772 = vset.pattern.permute.xlu1 %v792_v5  ;;  %773 = vset.pattern.permute.xlu0 %v793_v6  ;;  %v132_v37 = vrot.slane %v13_v22, %v123_v24  ;;  %v865_v38 = vadd.s32 256, %v847_v20  ;;  %v226_v39 = vshra.s32 %v847_v20, 4  ;;  %v44_v40 = vrot.slane %v24_v25, %v23_v18 }
   0xc   :  { %210 = vperm.xlu1 %772, %v831_v2   ;;  %352 = vperm.xlu0 %773, %v831_v2   ;;  %v48_v41 = vrot.slane %v28_v26, %v23_v18  ;;  %v52_v42 = vrot.slane %v32_v27, %v23_v18  ;;  %v227_v43 = vshra.s32 %v858_v28, 4  ;;  %v72_v44 = vrot.slane %v12_v21, %v71_v29 }
   0xd   :  { %v76_v45 = vrot.slane %v12_v21, %v75_v30  ;;  %v80_v46 = vrot.slane %v13_v22, %v71_v29  ;;  %v84_v47 = vrot.slane %v13_v22, %v75_v30  ;;  %v56_v48 = vrot.slane %v36_v32, %v23_v18 }
   0xe   :  { %v168_v49 = vrot.slane %v12_v21, %v860_v31  ;;  %v172_v50 = vrot.slane %v12_v21, %v171_v35  ;;  %v176_v51 = vrot.slane %v13_v22, %v860_v31  ;;  %v140_v52 = vrot.slane %v120_v33, %v855_v23 }
   0xf   :  { %v180_v53 = vrot.slane %v13_v22, %v171_v35  ;;  %v228_v54 = vshra.s32 %v865_v38, 4  ;;  %v873_v55 = vand.u32 15, %v226_v39  ;;  %v144_v58 = vrot.slane %v124_v34, %v855_v23 }
  0x10   :  { %774 = vset.pattern.permute.xlu1 %v794_v7  ;;  %776 = vset.pattern.permute.xlu0 %v795_v8  ;;  %v148_v59 = vrot.slane %v128_v36, %v855_v23  ;;  %v152_v60 = vrot.slane %v132_v37, %v855_v23  ;;  %v878_v61 = vand.u32 15, %v227_v43  ;;  %v92_v62 = vrot.slane %v72_v44, %v71_v29 }
  0x11   :  { %393 = vperm.xlu1 %774, %v831_v2   ;;  %475 = vperm.xlu0 %776, %v831_v2   ;;  %v96_v63 = vrot.slane %v76_v45, %v71_v29  ;;  %v100_v0 = vrot.slane %v80_v46, %v71_v29  ;;  %v104_v1 = vrot.slane %v84_v47, %v71_v29  ;;  %v884_v6 = vadd.s32 384, %v847_v20 }
  0x12   :  { %v188_v3 = vrot.slane %v168_v49, %v860_v31  ;;  %v192_v4 = vrot.slane %v172_v50, %v860_v31  ;;  %v196_v5 = vrot.slane %v176_v51, %v860_v31  ;;  %v200_v7 = vrot.slane %v180_v53, %v860_v31 }
  0x13   :  { %v887_v8 = vand.u32 15, %v228_v54  ;;  %vm294_vm0 = vcmp.ge.s32.totalorder %v873_v55, 0  ;;  %vm298_vm1 = vcmp.lt.s32.totalorder %v873_v55, 16  ;;  %vm295_vm2 = vcmp.ge.s32.totalorder %v878_v61, 0 }
  0x14   :  { %vm299_vm4 = vcmp.lt.s32.totalorder %v878_v61, 16  ;;  %v229_v39 = vshra.s32 %v884_v6, 4  ;;  %vm900_vm6 = vmand %vm294_vm0, %vm298_vm1 }
  0x15   :  { %775 = vset.pattern.permute.xlu1 %v796_v9  ;;  %778 = vset.pattern.permute.xlu0 %v797_v10  ;;  %vm296_vm3 = vcmp.ge.s32.totalorder %v887_v8, 0  ;;  %vm300_vm5 = vcmp.lt.s32.totalorder %v887_v8, 16  ;;  %vm906_vm7 = vmand %vm295_vm2, %vm299_vm4  ;;  %vm1388_vm2 = vcmp.lt.s32.totalorder %v847_v20, 16 }
  0x16   :  { %434 = vperm.xlu1 %775, %v831_v2   ;;  %544 = vperm.xlu0 %778, %v831_v2   ;;  %vm910_vm8 = vmand %vm296_vm3, %vm300_vm5  ;;  %v916_v51 = vand.u32 15, %v229_v39  ;;  %vm1392_vm3 = vcmp.lt.s32.totalorder %v847_v20, 17 }
  0x18   :  { %vm297_vm9 = vcmp.ge.s32.totalorder %v916_v51, 0  ;;  %vm301_vm10 = vcmp.lt.s32.totalorder %v916_v51, 16 }
  0x19   :  { %vm928_vm11 = vmand %vm297_vm9, %vm301_vm10 }
  0x1a   :  { %777 = vset.pattern.permute.xlu1 %v798_v11  ;;  %781 = vset.pattern.permute.xlu0 %v799_v12 }
  0x1b   :  { %503 = vperm.xlu1 %777, %v831_v2   ;;  %667 = vperm.xlu0 %781, %v831_v2  }
  0x1f   :  { %779 = vset.pattern.permute.xlu1 %v800_v13  ;;  %782 = vset.pattern.permute.xlu0 %v802_v15 }
  0x20   :  { %585 = vperm.xlu1 %779, %v831_v2  }
  0x24   :  { %780 = vset.pattern.permute.xlu1 %v801_v14 }
  0x25   :  { %626 = vperm.xlu1 %780, %v831_v2  }
  0x7d   :  { %v17_v56 = vpop.permute.xlu0 %16  ;;  %v115_v57 = vpop.permute.xlu1 %114 }
  0x7e   :  { %v57_v9 = vmul.f32 %v44_v40, %v17_v56  ;;  %v58_v10 = vmul.f32 %v48_v41, %v17_v56  ;;  %v59_v11 = vmul.f32 %v52_v42, %v17_v56  ;;  %v60_v12 = vmul.f32 %v56_v48, %v17_v56 }
  0x7f   :  { %v153_v13 = vmul.f32 %v140_v52, %v115_v57  ;;  %v154_v14 = vmul.f32 %v144_v58, %v115_v57  ;;  %v155_v15 = vmul.f32 %v148_v59, %v115_v57  ;;  %v156_v23 = vmul.f32 %v152_v60, %v115_v57 }
  0x80   :  { %v1400_v58 = vmov 0 }
  0x81   :  { %v1401_v58 = vsel %vm928_vm11, 4294967295, %v1400_v58 }
  0x82   :  { %v67_v16 = vpop.permute.xlu0 %66  ;;  %v163_v17 = vpop.permute.xlu1 %162 }
  0x83   :  { %v105_v18 = vmul.f32 %v92_v62, %v67_v16  ;;  %v106_v19 = vmul.f32 %v96_v63, %v67_v16  ;;  %v107_v21 = vmul.f32 %v100_v0, %v67_v16  ;;  %v108_v22 = vmul.f32 %v104_v1, %v67_v16 }
  0x84   :  { %v201_v24 = vmul.f32 %v188_v3, %v163_v17  ;;  %v202_v25 = vmul.f32 %v192_v4, %v163_v17  ;;  %v203_v26 = vmul.f32 %v196_v5, %v163_v17  ;;  %v204_v32 = vmul.f32 %v200_v7, %v163_v17 }
  0x85   :  { %v109_v27 = vadd.f32 %v105_v18, %v57_v9  ;;  %v110_v29 = vadd.f32 %v106_v19, %v58_v10  ;;  %v111_v30 = vadd.f32 %v107_v21, %v59_v11  ;;  %v112_v31 = vadd.f32 %v108_v22, %v60_v12 }
  0x86   :  { %v279_v16 = vadd.s32 4294967295, %v878_v61  ;;  %v222_v17 = vand.u32 15, %v847_v20  ;;  %v278_v18 = vadd.s32 4294967295, %v873_v55 }
  0x87   :  { %v211_v33 = vpop.permute.xlu1 %210  ;;  %v157_v34 = vadd.f32 %v153_v13, %v109_v27  ;;  %v158_v35 = vadd.f32 %v154_v14, %v110_v29  ;;  %v159_v36 = vadd.f32 %v155_v15, %v111_v30  ;;  %v160_v37 = vadd.f32 %v156_v23, %v112_v31  ;;  %v947_v3 = vpop.permute.xlu0 %352 }
  0x88   :  { %v223_v13 = vand.u32 15, %v858_v28  ;;  %vm283_vm12 = vcmp.ge.s32.totalorder %v279_v16, 0  ;;  %vm287_vm13 = vcmp.lt.s32.totalorder %v279_v16, 16  ;;  %v971_v23 = vadd.s32 4294967295, %v222_v17 }
  0x89   :  { %v205_v41 = vadd.f32 %v201_v24, %v157_v34  ;;  %v206_v42 = vadd.f32 %v202_v25, %v158_v35  ;;  %v207_v43 = vadd.f32 %v203_v26, %v159_v36  ;;  %v208_v46 = vadd.f32 %v204_v32, %v160_v37  ;;  %vm978_vm1 = vmand %vm283_vm12, %vm287_vm13 }
  0x8a   :  { %v967_v19 = vadd.s32 4294967295, %v223_v13  ;;  %v224_v28 = vand.u32 15, %v865_v38  ;;  %vm282_vm14 = vcmp.ge.s32.totalorder %v278_v18, 0  ;;  %vm286_vm15 = vcmp.lt.s32.totalorder %v278_v18, 16 }
  0x8b   :  { %v213_v47 = vadd.f32 %v211_v33, %v205_v41  ;;  %v214_v48 = vadd.f32 %v211_v33, %v206_v42  ;;  %v215_v49 = vadd.f32 %v211_v33, %v207_v43  ;;  %v216_v56 = vadd.f32 %v211_v33, %v208_v46  ;;  %vm987_vm5 = vmand %vm282_vm14, %vm286_vm15 }
  0x8c   :  { %v914_v50 = vpop.permute.xlu1 %393  ;;  %v949_v4 = vpop.permute.xlu0 %475  ;;  %v280_v24 = vadd.s32 4294967295, %v887_v8  ;;  %v225_v25 = vand.u32 15, %v884_v6  ;;  %v281_v26 = vadd.s32 4294967295, %v916_v51  ;;  %vm1387_vm0 = vcmp.ge.s32.totalorder %v967_v19, 0 }
  0x8d   :  { %324 = vrot.lane.b32.xlu1 %v214_v48, %s803_s0  ;;  %322 = vrot.lane.b32.xlu0 %v213_v47, %s803_s0  ;;  %v498_v52 = vsel %vm900_vm6, %v213_v47, 0.0  ;;  %v499_v53 = vsel %vm906_vm7, %v214_v48, 0.0  ;;  %v500_v54 = vsel %vm910_vm8, %v215_v49, 0.0  ;;  %v501_v60 = vsel %vm928_vm11, %v216_v56, 0.0  ;;  %vm999_vm12 = vmand %vm978_vm1, %vm1387_vm0 }
  0x8e   :  { %v983_v31 = vadd.s32 1, %v223_v13  ;;  %vm1389_vm4 = vcmp.ge.s32.totalorder %v971_v23, 0  ;;  %v991_v6 = vadd.s32 4294967295, %v224_v28  ;;  %vm284_vm9 = vcmp.ge.s32.totalorder %v280_v24, 0 }
  0x8f   :  { %vm288_vm10 = vcmp.lt.s32.totalorder %v280_v24, 16  ;;  %v993_v32 = vadd.s32 1, %v222_v17  ;;  %v1005_v35 = vadd.s32 4294967295, %v225_v25  ;;  %vm285_vm13 = vcmp.ge.s32.totalorder %v281_v26, 0  ;;  %vm1014_vm15 = vmand %vm987_vm5, %vm1389_vm4 }
  0x90   :  { %vm289_vm14 = vcmp.lt.s32.totalorder %v281_v26, 16  ;;  %v1019_v42 = vadd.s32 1, %v224_v28  ;;  %v1021_v43 = vadd.s32 1, %v225_v25  ;;  %vm1029_vm4 = vmand %vm284_vm9, %vm288_vm10  ;;  %vm1412_vm11 = vcmp.lt.s32.totalorder %v847_v20, 16 }
  0x91   :  { %363 = vrot.lane.b32.xlu1 %v213_v47, %s804_s14  ;;  %328 = vrot.lane.b32.xlu0 %v216_v56, %s803_s0  ;;  %v926_v57 = vpop.permute.xlu1 %434  ;;  %v953_v7 = vpop.permute.xlu0 %544  ;;  %vm1038_vm0 = vmand %vm285_vm13, %vm289_vm14  ;;  %vm1415_vm10 = vcmp.lt.s32.totalorder %v983_v31, 16  ;;  %vm1418_vm13 = vcmp.ge.s32.totalorder %v991_v6, 0  ;;  %v1097_v27 = vadd.s32 1, %v873_v55 }
  0x92   :  { %vm1061_vm14 = vmand %vm1029_vm4, %vm1418_vm13  ;;  %vm273_vm9 = vcmp.lt.s32.totalorder %v1021_v43, 16 }
  0x95   :  { %369 = vrot.lane.b32.xlu1 %v216_v56, %s804_s14  ;;  %365 = vrot.lane.b32.xlu0 %v214_v48, %s804_s14 }
  0x96   :  { %v504_v59 = vpop.permute.xlu1 %503  ;;  %v957_v10 = vpop.permute.xlu0 %667 }
  0x97   :  { %v934_v62 = vmul.f32 %v504_v59, %v498_v52  ;;  %v936_v63 = vmul.f32 %v504_v59, %v499_v53  ;;  %v938_v0 = vmul.f32 %v504_v59, %v500_v54  ;;  %v940_v1 = vmul.f32 %v504_v59, %v501_v60 }
  0x99   :  { %326 = vrot.lane.b32.xlu1 %v215_v49, %s803_s0  ;;  %404 = vrot.lane.b32.xlu0 %v213_v47, %s805_s15 }
  0x9b   :  { %v951_v5 = vpop.permute.xlu1 %585 }
  0x9d   :  { %367 = vrot.lane.b32.xlu1 %v215_v49, %s804_s14  ;;  %410 = vrot.lane.b32.xlu0 %v216_v56, %s805_s15 }
  0xa0   :  { %v955_v9 = vpop.permute.xlu1 %626 }
  0xa1   :  { %406 = vrot.lane.b32.xlu1 %v214_v48, %s805_s15  ;;  %408 = vrot.lane.b32.xlu0 %v215_v49, %s805_s15 }
  0xa5   :  { %445 = vrot.lane.b32.xlu1 %v213_v47, %s806_s16  ;;  %447 = vrot.lane.b32.xlu0 %v214_v48, %s806_s16 }
  0xa9   :  { %451 = vrot.lane.b32.xlu1 %v216_v56, %s806_s16  ;;  %514 = vrot.lane.b32.xlu0 %v213_v47, %s807_s17 }
  0xad   :  { %449 = vrot.lane.b32.xlu1 %v215_v49, %s806_s16  ;;  %518 = vrot.lane.b32.xlu0 %v215_v49, %s807_s17 }
  0xb1   :  { %516 = vrot.lane.b32.xlu1 %v214_v48, %s807_s17  ;;  %520 = vrot.lane.b32.xlu0 %v216_v56, %s807_s17 }
  0xb5   :  { %555 = vrot.lane.b32.xlu1 %v213_v47, %s808_s18  ;;  %557 = vrot.lane.b32.xlu0 %v214_v48, %s808_s18 }
  0xb9   :  { %559 = vrot.lane.b32.xlu1 %v215_v49, %s808_s18  ;;  %598 = vrot.lane.b32.xlu0 %v214_v48, %s809_s19 }
  0xbd   :  { %561 = vrot.lane.b32.xlu1 %v216_v56, %s808_s18  ;;  %602 = vrot.lane.b32.xlu0 %v216_v56, %s809_s19 }
  0xc1   :  { %596 = vrot.lane.b32.xlu1 %v213_v47, %s809_s19  ;;  %639 = vrot.lane.b32.xlu0 %v214_v48, %s810_s20 }
  0xc5   :  { %600 = vrot.lane.b32.xlu1 %v215_v49, %s809_s19  ;;  %679 = vperm.xlu0 %782, %v831_v2  }
  0xc9   :  { %637 = vrot.lane.b32.xlu1 %v213_v47, %s810_s20 }
  0xcd   :  { %641 = vrot.lane.b32.xlu1 %v215_v49, %s810_s20 }
  0xd1   :  { %643 = vrot.lane.b32.xlu1 %v216_v56, %s810_s20 }
  0xff   :  { %v959_v11 = vpop.permute.xlu1 %324  ;;  %v323_v12 = vpop.permute.xlu0 %322 }
 0x100   :  { %v333_v36 = vsel %vm1392_vm3, %v323_v12, %v959_v11 }
 0x101   :  { %v348_v53 = vsel %vm999_vm12, %v333_v36, 0.0  ;;  %vm272_vm12 = vcmp.lt.s32.totalorder %v1019_v42, 16 }
 0x102   :  { %v356_v28 = vmul.f32 %v947_v3, %v348_v53 }
 0x103   :  { %v364_v14 = vpop.permute.xlu1 %363  ;;  %v962_v15 = vpop.permute.xlu0 %328 }
 0x104   :  { %v334_v46 = vsel %vm1392_vm3, %v962_v15, %v323_v12  ;;  %vm1393_vm3 = vcmp.lt.s32.totalorder %v993_v32, 16 }
 0x105   :  { %v347_v56 = vsel %vm1014_vm15, %v334_v46, 0.0  ;;  %vm1075_vm15 = vmand %vm987_vm5, %vm1393_vm3  ;;  %vm1427_vm3 = vcmp.lt.s32.totalorder %v847_v20, 17 }
 0x107   :  { %v969_v21 = vpop.permute.xlu1 %369  ;;  %v366_v22 = vpop.permute.xlu0 %365 }
 0x108   :  { %v374_v34 = vsel %vm1388_vm2, %v364_v14, %v366_v22  ;;  %v375_v48 = vsel %vm1412_vm11, %v969_v21, %v364_v14  ;;  %vm412_vm2 = vcmp.lt.s32.totalorder %v847_v20, 15  ;;  %vm1051_vm11 = vmand %vm978_vm1, %vm1415_vm10  ;;  %vm1423_vm10 = vcmp.ge.s32.totalorder %v1005_v35, 0 }
 0x109   :  { %v389_v49 = vsel %vm978_vm1, %v374_v34, 0.0  ;;  %v388_v13 = vsel %vm987_vm5, %v375_v48, 0.0  ;;  %vm1088_vm13 = vmand %vm1038_vm0, %vm1423_vm10  ;;  %vm1426_vm5 = vcmp.lt.s32.totalorder %v847_v20, 16 }
 0x10a   :  { %v397_v14 = vmul.f32 %v914_v50, %v389_v49  ;;  %vm1428_vm1 = vmmov %vm1427_vm3  ;;  %v396_v34 = vmul.f32 %v914_v50, %v388_v13 }
 0x10b   :  { %v327_v29 = vpop.permute.xlu1 %326  ;;  %v405_v30 = vpop.permute.xlu0 %404  ;;  %vm1429_vm10 = vmmov %vm1426_vm5 }
 0x10c   :  { %v332_v38 = vsel %vm1428_vm1, %v959_v11, %v327_v29  ;;  %vm1137_vm1 = vmand %vm1038_vm0, %vm273_vm9 }
 0x10d   :  { %v349_v54 = vsel %vm1061_vm14, %v332_v38, 0.0 }
 0x10f   :  { %v368_v39 = vpop.permute.xlu1 %367  ;;  %v411_v41 = vpop.permute.xlu0 %410 }
 0x110   :  { %v416_v17 = vsel %vm412_vm2, %v411_v41, %v405_v30  ;;  %v373_v25 = vsel %vm1426_vm5, %v366_v22, %v368_v39  ;;  %v372_v33 = vsel %vm1429_vm10, %v368_v39, %v969_v21  ;;  %vm1430_vm5 = vcmp.ge.s32.totalorder %v967_v19, 0 }
 0x111   :  { %v429_v11 = vsel %vm1075_vm15, %v416_v17, 0.0  ;;  %v401_v39 = vadd.f32 %v397_v14, %v356_v28  ;;  %v390_v46 = vsel %vm1029_vm4, %v373_v25, 0.0  ;;  %vm1437_vm15 = vcmp.lt.s32.totalorder %v847_v20, 1 }
 0x112   :  { %v437_v13 = vmul.f32 %v926_v57, %v429_v11  ;;  %v398_v14 = vmul.f32 %v914_v50, %v390_v46  ;;  %vm1441_vm10 = vmmov %vm1437_vm15  ;;  %v308_v46 = vadd.s32 1, %v887_v8 }
 0x113   :  { %v407_v60 = vpop.permute.xlu1 %406  ;;  %v409_v12 = vpop.permute.xlu0 %408 }
 0x114   :  { %v415_v18 = vsel %vm412_vm2, %v405_v30, %v407_v60  ;;  %v331_v30 = vsel %vm1427_vm3, %v327_v29, %v962_v15  ;;  %v355_v15 = vmul.f32 %v947_v3, %v347_v56  ;;  %vm1125_vm3 = vmand %vm1029_vm4, %vm272_vm12  ;;  %v414_v29 = vsel %vm412_vm2, %v407_v60, %v409_v12 }
 0x115   :  { %v430_v26 = vsel %vm1051_vm11, %v415_v18, 0.0  ;;  %vm1113_vm11 = vmand %vm906_vm7, %vm1430_vm5  ;;  %v413_v49 = vsel %vm412_vm2, %v409_v12, %v411_v41  ;;  %v350_v47 = vsel %vm1088_vm13, %v331_v30, 0.0  ;;  %v391_v56 = vsel %vm1038_vm0, %v372_v33, 0.0 }
 0x116   :  { %v438_v22 = vmul.f32 %v926_v57, %v430_v26  ;;  %vm522_vm4 = vcmp.lt.s32.totalorder %v847_v20, 127  ;;  %v431_v12 = vsel %vm1125_vm3, %v414_v29, 0.0  ;;  %vm1438_vm2 = vcmp.ge.s32.totalorder %v971_v23, 0 }
 0x117   :  { %v446_v36 = vpop.permute.xlu1 %445  ;;  %v448_v37 = vpop.permute.xlu0 %447  ;;  %vm1162_vm14 = vmand %vm900_vm6, %vm1438_vm2  ;;  %v432_v16 = vsel %vm1137_vm1, %v413_v49, 0.0  ;;  %vm310_vm0 = vcmp.ge.s32.totalorder %v1097_v27, 0  ;;  %vm314_vm13 = vcmp.lt.s32.totalorder %v1097_v27, 16  ;;  %v400_v28 = vadd.f32 %v396_v34, %v355_v15 }
 0x118   :  { %v456_v53 = vsel %vm1437_vm15, %v446_v36, %v448_v37  ;;  %v442_v41 = vadd.f32 %v438_v22, %v401_v39  ;;  %v399_v24 = vmul.f32 %v914_v50, %v391_v56  ;;  %v357_v30 = vmul.f32 %v947_v3, %v349_v54  ;;  %vm1449_vm2 = vmmov %vm1441_vm10 }
 0x119   :  { %v471_v60 = vsel %vm1113_vm11, %v456_v53, 0.0  ;;  %v358_v38 = vmul.f32 %v947_v3, %v350_v47  ;;  %v439_v33 = vmul.f32 %v926_v57, %v431_v12  ;;  %vm1442_vm5 = vcmp.ge.s32.totalorder %v991_v6, 0 }
 0x11a   :  { %v479_v59 = vmul.f32 %v949_v4, %v471_v60  ;;  %vm1183_vm11 = vmand %vm910_vm8, %vm1442_vm5  ;;  %v441_v50 = vadd.f32 %v437_v13, %v400_v28  ;;  %v440_v15 = vmul.f32 %v926_v57, %v432_v16  ;;  %vm1445_vm3 = vcmp.ge.s32.totalorder %v1005_v35, 0 }
 0x11b   :  { %v452_v17 = vpop.permute.xlu1 %451  ;;  %v515_v18 = vpop.permute.xlu0 %514  ;;  %vm1446_vm1 = vnez %v1401_v58  ;;  %v402_v21 = vadd.f32 %v398_v14, %v357_v30  ;;  %v307_v39 = vadd.s32 1, %v878_v61  ;;  %v309_v57 = vadd.s32 1, %v916_v51 }
 0x11c   :  { %v483_v25 = vadd.f32 %v479_v59, %v442_v41  ;;  %v457_v26 = vsel %vm1441_vm10, %v452_v17, %v446_v36  ;;  %vm1193_vm15 = vmand %vm1446_vm1, %vm1445_vm3  ;;  %v403_v48 = vadd.f32 %v399_v24, %v358_v38  ;;  %vm1451_vm10 = vcmp.lt.s32.totalorder %v993_v32, 16 }
 0x11d   :  { %v470_v22 = vsel %vm1162_vm14, %v457_v26, 0.0  ;;  %vm1450_vm14 = vmmov %vm1449_vm2  ;;  %v443_v61 = vadd.f32 %v439_v33, %v402_v21  ;;  %vm1454_vm3 = vcmp.lt.s32.totalorder %v983_v31, 16 }
 0x11e   :  { %v478_v34 = vmul.f32 %v949_v4, %v470_v22  ;;  %v511_v11 = vadd.f32 %v936_v63, %v483_v25  ;;  %vm1209_vm5 = vmand %vm900_vm6, %vm1451_vm10  ;;  %vm563_vm6 = vcmp.lt.s32.totalorder %v847_v20, 113  ;;  %v444_v40 = vadd.f32 %v440_v15, %v403_v48 }
 0x11f   :  { %v450_v29 = vpop.permute.xlu1 %449  ;;  %v519_v36 = vpop.permute.xlu0 %518  ;;  %vm312_vm10 = vcmp.ge.s32.totalorder %v308_v46, 0 }
 0x120   :  { %v482_v49 = vadd.f32 %v478_v34, %v441_v50  ;;  %v454_v53 = vsel %vm1449_vm2, %v450_v29, %v452_v17  ;;  %v455_v54 = vsel %vm1450_vm14, %v448_v37, %v450_v29  ;;  %vm1221_vm2 = vmand %vm906_vm7, %vm1454_vm3  ;;  %vm315_vm14 = vcmp.lt.s32.totalorder %v307_v39, 16 }
 0x121   :  { %v472_v8 = vsel %vm1183_vm11, %v455_v54, 0.0  ;;  %v473_v51 = vsel %vm1193_vm15, %v454_v53, 0.0  ;;  %vm1233_vm11 = vmand %vm910_vm8, %vm272_vm12  ;;  %vm311_vm15 = vcmp.ge.s32.totalorder %v307_v39, 0  ;;  %vm313_vm3 = vcmp.ge.s32.totalorder %v309_v57, 0 }
 0x122   :  { %v480_v47 = vmul.f32 %v949_v4, %v472_v8  ;;  %v481_v56 = vmul.f32 %v949_v4, %v473_v51  ;;  %v510_v60 = vadd.f32 %v934_v62, %v482_v49  ;;  %vm1241_vm7 = vmand %vm1446_vm1, %vm273_vm9  ;;  %vm316_vm1 = vcmp.lt.s32.totalorder %v308_v46, 16 }
 0x123   :  { %v517_v44 = vpop.permute.xlu1 %516  ;;  %v521_v4 = vpop.permute.xlu0 %520  ;;  %vm1253_vm8 = vmand %vm310_vm0, %vm314_vm13 }
 0x124   :  { %v484_v62 = vadd.f32 %v480_v47, %v443_v61  ;;  %v485_v45 = vadd.f32 %v481_v56, %v444_v40  ;;  %v524_v12 = vsel %vm522_vm4, %v517_v44, %v519_v36  ;;  %v525_v59 = vsel %vm522_vm4, %v515_v18, %v517_v44  ;;  %vm1271_vm0 = vmand %vm311_vm15, %vm315_vm14 }
 0x125   :  { %v539_v52 = vsel %vm1209_vm5, %v525_v59, 0.0  ;;  %v540_v14 = vsel %vm1221_vm2, %v524_v12, 0.0  ;;  %v523_v16 = vsel %vm522_vm4, %v519_v36, %v521_v4  ;;  %v526_v17 = vsel %vm522_vm4, %v521_v4, %v515_v18 }
 0x126   :  { %v547_v28 = vmul.f32 %v953_v7, %v539_v52  ;;  %v548_v27 = vmul.f32 %v953_v7, %v540_v14  ;;  %v512_v24 = vadd.f32 %v938_v0, %v484_v62  ;;  %v513_v25 = vadd.f32 %v940_v1, %v485_v45 }
 0x127   :  { %v541_v30 = vsel %vm1233_vm11, %v523_v16, 0.0  ;;  %v542_v18 = vsel %vm1241_vm7, %v526_v17, 0.0  ;;  %v556_v38 = vpop.permute.xlu1 %555  ;;  %vm1465_vm4 = vcmp.ge.s32.totalorder %v971_v23, 0  ;;  %v558_v0 = vpop.permute.xlu0 %557  ;;  %vm317_vm5 = vcmp.lt.s32.totalorder %v309_v57, 16  ;;  %vm1292_vm7 = vmand %vm312_vm10, %vm316_vm1 }
 0x128   :  { %vm568_vm13 = vmand %vm1253_vm8, %vm1465_vm4  ;;  %v551_v1 = vadd.f32 %v547_v28, %v510_v60  ;;  %v552_v33 = vadd.f32 %v548_v27, %v511_v11  ;;  %v549_v22 = vmul.f32 %v953_v7, %v541_v30  ;;  %v550_v55 = vmul.f32 %v953_v7, %v542_v18 }
 0x129   :  { %v566_v50 = vsel %vm563_vm6, %v556_v38, %v558_v0  ;;  %vm1466_vm2 = vcmp.ge.s32.totalorder %v967_v19, 0  ;;  %vm1298_vm15 = vmand %vm313_vm3, %vm317_vm5  ;;  %vm1471_vm14 = vcmp.ge.s32.totalorder %v991_v6, 0  ;;  %vm1472_vm4 = vcmp.ge.s32.totalorder %v1005_v35, 0 }
 0x12a   :  { %vm569_vm11 = vmand %vm1271_vm0, %vm1466_vm2  ;;  %v553_v23 = vadd.f32 %v549_v22, %v512_v24  ;;  %v554_v15 = vadd.f32 %v550_v55, %v513_v25  ;;  %v580_v34 = vsel %vm568_vm13, %v566_v50, 0.0  ;;  %vm604_vm13 = vcmp.lt.s32.totalorder %v847_v20, 112 }
 0x12b   :  { %v588_v11 = vmul.f32 %v951_v5, %v580_v34  ;;  %v560_v21 = vpop.permute.xlu1 %559  ;;  %v599_v39 = vpop.permute.xlu0 %598  ;;  %vm570_vm10 = vmand %vm1292_vm7, %vm1471_vm14  ;;  %vm1473_vm1 = vcmp.lt.s32.totalorder %v993_v32, 16  ;;  %vm1474_vm2 = vcmp.lt.s32.totalorder %v983_v31, 16 }
 0x12c   :  { %v565_v19 = vsel %vm563_vm6, %v558_v0, %v560_v21  ;;  %vm571_vm3 = vmand %vm1298_vm15, %vm1472_vm4 }
 0x12d   :  { %v592_v29 = vadd.f32 %v588_v11, %v551_v1  ;;  %v581_v36 = vsel %vm569_vm11, %v565_v19, 0.0  ;;  %vm650_vm5 = vmand %vm1253_vm8, %vm1473_vm1 }
 0x12e   :  { %v589_v46 = vmul.f32 %v951_v5, %v581_v36  ;;  %vm651_vm11 = vmand %vm1271_vm0, %vm1474_vm2 }
 0x12f   :  { %v562_v57 = vpop.permute.xlu1 %561  ;;  %v603_v35 = vpop.permute.xlu0 %602  ;;  %vm653_vm14 = vmand %vm1298_vm15, %vm273_vm9 }
 0x130   :  { %v593_v48 = vadd.f32 %v589_v46, %v552_v33  ;;  %v564_v49 = vsel %vm563_vm6, %v560_v21, %v562_v57  ;;  %v567_v53 = vsel %vm563_vm6, %v562_v57, %v556_v38  ;;  %vm645_vm6 = vcmp.lt.s32.totalorder %v847_v20, 111 }
 0x131   :  { %v582_v54 = vsel %vm570_vm10, %v564_v49, 0.0  ;;  %v583_v6 = vsel %vm571_vm3, %v567_v53, 0.0  ;;  %v811_v49 = vmov 15  }
 0x132   :  { %v590_v63 = vmul.f32 %v951_v5, %v582_v54  ;;  %v591_v61 = vmul.f32 %v951_v5, %v583_v6  ;;  %783 = vset.pattern.permute.xlu1 %v811_v49 }
 0x133   :  { %v597_v8 = vpop.permute.xlu1 %596  ;;  %v640_v16 = vpop.permute.xlu0 %639 }
 0x134   :  { %v594_v51 = vadd.f32 %v590_v63, %v553_v23  ;;  %v595_v37 = vadd.f32 %v591_v61, %v554_v15  ;;  %v607_v40 = vsel %vm604_vm13, %v597_v8, %v599_v39  ;;  %v608_v47 = vsel %vm604_vm13, %v603_v35, %v597_v8 }
 0x135   :  { %v621_v56 = vsel %vm1253_vm8, %v607_v40, 0.0  ;;  %v624_v60 = vsel %vm1298_vm15, %v608_v47, 0.0  ;;  %vm652_vm8 = vmand %vm1292_vm7, %vm272_vm12  ;;  %v812_v8 = vmov 16  }
 0x136   :  { %v629_v13 = vmul.f32 %v955_v9, %v621_v56  ;;  %v632_v5 = vmul.f32 %v955_v9, %v624_v60  ;;  %785 = vset.pattern.permute.xlu0 %v812_v8 }
 0x137   :  { %v601_v44 = vpop.permute.xlu1 %600 }
 0x138   :  { %v633_v41 = vadd.f32 %v629_v13, %v592_v29  ;;  %v636_v4 = vadd.f32 %v632_v5, %v595_v37  ;;  %v605_v62 = vsel %vm604_vm13, %v601_v44, %v603_v35  ;;  %v606_v45 = vsel %vm604_vm13, %v599_v39, %v601_v44 }
 0x139   :  { %v622_v12 = vsel %vm1271_vm0, %v606_v45, 0.0  ;;  %v623_v59 = vsel %vm1292_vm7, %v605_v62, 0.0 }
 0x13a   :  { %v630_v52 = vmul.f32 %v955_v9, %v622_v12  ;;  %v631_v14 = vmul.f32 %v955_v9, %v623_v59 }
 0x13b   :  { %v638_v17 = vpop.permute.xlu1 %637 }
 0x13c   :  { %v634_v28 = vadd.f32 %v630_v52, %v593_v48  ;;  %v635_v27 = vadd.f32 %v631_v14, %v594_v51  ;;  %v648_v24 = vsel %vm645_vm6, %v638_v17, %v640_v16 }
 0x13d   :  { %v662_v25 = vsel %vm650_vm5, %v648_v24, 0.0 }
 0x13e   :  { %v670_v30 = vmul.f32 %v957_v10, %v662_v25 }
 0x13f   :  { %v642_v9 = vpop.permute.xlu1 %641 }
 0x140   :  { %v674_v32 = vadd.f32 %v670_v30, %v633_v41  ;;  %v647_v58 = vsel %vm645_vm6, %v640_v16, %v642_v9  ;;  %v680_v31 = vpop.permute.xlu0 %679 }
 0x141   :  { %v663_v18 = vsel %vm651_vm11, %v647_v58, 0.0 }
 0x142   :  { %v671_v38 = vmul.f32 %v957_v10, %v663_v18  ;;  %v682_v55 = vadd.f32 %v680_v31, %v674_v32 }
 0x143   :  { %v644_v26 = vpop.permute.xlu1 %643 }
 0x144   :  { %v675_v0 = vadd.f32 %v671_v38, %v634_v28  ;;  %v646_v1 = vsel %vm645_vm6, %v642_v9, %v644_v26  ;;  %v649_v33 = vsel %vm645_vm6, %v644_v26, %v638_v17  ;;  %v692_v19 = vmul.f32 %v682_v55, %v682_v55 }
 0x145   :  { %v664_v42 = vsel %vm652_vm8, %v646_v1, 0.0  ;;  %v665_v22 = vsel %vm653_vm14, %v649_v33, 0.0 }
 0x146   :  { %v683_v50 = vadd.f32 %v680_v31, %v675_v0  ;;  %v672_v23 = vmul.f32 %v957_v10, %v664_v42  ;;  %v673_v43 = vmul.f32 %v957_v10, %v665_v22 }
 0x148   :  { %v676_v15 = vadd.f32 %v672_v23, %v635_v27  ;;  %v677_v34 = vadd.f32 %v673_v43, %v636_v4  ;;  %v693_v3 = vmul.f32 %v683_v50, %v683_v50  ;;  %v686_v7 = vadd.f32 %v683_v50, %v682_v55 }
 0x14a   :  { %v684_v11 = vadd.f32 %v680_v31, %v676_v15  ;;  %v685_v21 = vadd.f32 %v680_v31, %v677_v34  ;;  %v696_v39 = vadd.f32 %v693_v3, %v692_v19 }
 0x14c   :  { %v687_v29 = vadd.f32 %v686_v7, %v684_v11  ;;  %v694_v36 = vmul.f32 %v684_v11, %v684_v11  ;;  %v695_v46 = vmul.f32 %v685_v21, %v685_v21 }
 0x14e   :  { %v688_v20 = vadd.f32 %v687_v29, %v685_v21  ;;  %v697_v57 = vadd.f32 %v696_v39, %v694_v36 }
 0x150   :  { %689 = vadd.xlane.f32.xlu1 %v688_v20  ;;  %v698_v48 = vadd.f32 %v697_v57, %v695_v46 }
 0x152   :  { %699 = vadd.xlane.f32.xlu0 %v698_v48 }
 0x1d9   :  { %v690_v53 = vpop.xlane.xlu1 %689 }
 0x1da   :  { %v691_v10 = vmul.f32 0.001953125, %v690_v53 }
 0x1db   :  { %v700_v54 = vpop.xlane.xlu0 %699 }
 0x1dc   :  { %v702_v6 = vmul.f32 %v691_v10, %v691_v10  ;;  %v701_v63 = vmul.f32 0.001953125, %v700_v54 }
 0x1de   :  { %v703_v61 = vsub.f32 %v701_v63, %v702_v6 }
 0x1e0   :  { %v704_v35 = vadd.f32 1e-05, %v703_v61 }
 0x1e2   :  { %786 = vrsqrt.f32 %v704_v35 }
 0x1ef   :  { %v787_v51 = vpop.eup %786 }
 0x1f0   :  { %v706_v37 = vmul.f32 %v787_v51, %v831_v2 }
 0x1f2   :  { %715 = vperm.xlu1 %783, %v706_v37   ;;  %v707_v40 = vmul.f32 %v706_v37, %v691_v10 }
 0x1f4   :  { %709 = vrot.lane.b32.xlu0 %v707_v40, %s806_s16 }
 0x1f6   :  { %784 = vset.pattern.permute.xlu1 %v812_v8 }
 0x266   :  { %v710_v47 = vpop.permute.xlu0 %709 }
 0x267   :  { %v712_v56 = vsub.f32 %v831_v2, %v710_v47 }
 0x269   :  { %724 = vperm.xlu1 %784, %v712_v56  }
 0x26d   :  { %v716_v60 = vpop.permute.xlu1 %715 }
 0x26e   :  { %v718_v13 = vmul.f32 %v716_v60, %v682_v55  ;;  %v719_v5 = vmul.f32 %v716_v60, %v683_v50  ;;  %v720_v44 = vmul.f32 %v716_v60, %v684_v11  ;;  %v721_v41 = vmul.f32 %v716_v60, %v685_v21 }
 0x2e4   :  { %v725_v4 = vpop.permute.xlu1 %724 }
 0x2e5   :  { %v727_v62 = vadd.f32 %v725_v4, %v718_v13  ;;  %v728_v45 = vadd.f32 %v725_v4, %v719_v5  ;;  %v729_v12 = vadd.f32 %v725_v4, %v720_v44  ;;  %v730_v59 = vadd.f32 %v725_v4, %v721_v41 }
 0x2e7   :  { %v731_v52 = vmax.f32 %v727_v62, 0.0  ;;  %v732_v14 = vmax.f32 %v728_v45, 0.0  ;;  %v733_v16 = vmax.f32 %v729_v12, 0.0  ;;  %v734_v17 = vmax.f32 %v730_v59, 0.0 }
 0x2e9   :  { %735 = vst [vmem:[%s1386_s2] sm:$0xff] %v731_v52  ;;  %736 = vst [vmem:[%s1386_s2 + $0x8] sm:$0xff] %v732_v14 }
 0x2ea   :  { %737 = vst [vmem:[%s1386_s2 + $0x10] sm:$0xff] %v733_v16  ;;  %738 = vst [vmem:[%s1386_s2 + $0x18] sm:$0xff] %v734_v17 }

</bundles_post_ra>
